<compile_context>
chip_gen: v7x
topology: tpu7x:2x2x1
jax: 0.10.0
libtpu: 0.0.40
codegen_flags: <defaults>
</compile_context>

<pallas_src>
import functools

import jax
import jax.numpy as jnp
from jax.experimental import pallas as pl
from jax.experimental.pallas import tpu as pltpu


def _nmse_partial_kernel(x_ref, t_ref, d2_ref, t2_ref, *, valid_rows, tile_rows):
    """Per-block partial sums: d2 = sum_rows((x-t)^2), t2 = sum_rows(t^2)."""
    i = pl.program_id(0)

    x = x_ref[...].astype(jnp.float32)
    t = t_ref[...].astype(jnp.float32)

    if valid_rows % tile_rows != 0:
        # Last block extends past the logical end of the array; mask those
        # rows out with a select (padding contents are unspecified).
        row = jax.lax.broadcasted_iota(jnp.int32, x.shape, 0)
        mask = (i * tile_rows + row) < valid_rows
        x = jnp.where(mask, x, 0.0)
        t = jnp.where(mask, t, 0.0)

    d = x - t
    d2_ref[...] = jnp.sum(d * d, axis=0, keepdims=True)
    t2_ref[...] = jnp.sum(t * t, axis=0, keepdims=True)


def normalized_mse_loss(inputs, targets, *, target_block_bytes=2 * 1024 * 1024):
    """Pallas TPU implementation of Normalized_MSELoss.forward."""
    assert inputs.shape == targets.shape, "inputs/targets must match shapes"

    x = inputs.reshape(-1)
    t = targets.reshape(-1)
    total = x.size

    # Pick the widest lane count that divides the element count (lane-dense
    # last dim, no copy). Rare fallback: zero-pad the flat tail to a lane
    # multiple (zeros add nothing to either sum).
    lanes = next((c for c in (512, 256, 128) if total % c == 0), None)
    if lanes is None:
        lanes = 128
        pad = (-total) % lanes
        x = jnp.pad(x, (0, pad))
        t = jnp.pad(t, (0, pad))
        total += pad

    rows = total // lanes
    itemsize = jnp.dtype(inputs.dtype).itemsize

    # MiB-scale row tile (multiple of 8). If the whole slab is small, use a
    # single full-array block (exempt from the (8,128) divisibility rule).
    max_tile_rows = max(8, (target_block_bytes // (lanes * itemsize)) // 8 * 8)
    tile_rows = rows if rows <= max_tile_rows else max_tile_rows
    num_blocks = pl.cdiv(rows, tile_rows)

    block_bytes = tile_rows * lanes * itemsize
    # 2 inputs x 2 pipeline buffers + partial-sum outputs + headroom.
    vmem_limit = min(max(4 * block_bytes + (4 << 20), 16 << 20), 48 << 20)

    kernel = functools.partial(
        _nmse_partial_kernel, valid_rows=rows, tile_rows=tile_rows)

    d2, t2 = pl.pallas_call(
        kernel,
        out_shape=(
            jax.ShapeDtypeStruct((num_blocks, lanes), jnp.float32),
            jax.ShapeDtypeStruct((num_blocks, lanes), jnp.float32),
        ),
        grid_spec=pltpu.PrefetchScalarGridSpec(
            num_scalar_prefetch=0,
            grid=(num_blocks,),
            in_specs=[
                pl.BlockSpec((tile_rows, lanes), lambda i: (i, 0)),
                pl.BlockSpec((tile_rows, lanes), lambda i: (i, 0)),
            ],
            out_specs=[
                pl.BlockSpec((1, lanes), lambda i: (i, 0)),
                pl.BlockSpec((1, lanes), lambda i: (i, 0)),
            ],
        ),
        compiler_params=pltpu.CompilerParams(
            dimension_semantics=("parallel",),
            vmem_limit_bytes=vmem_limit,
        ),
    )(x.reshape(rows, lanes), t.reshape(rows, lanes))

    # Tiny finish: num_blocks x lanes elements each.
    # Note: all-zero targets yield NaN/Inf, matching the PyTorch reference.
    return jnp.sum(d2) / jnp.sum(t2)


if __name__ == "__main__":
    key = jax.random.PRNGKey(0)
    k1, k2 = jax.random.split(key)

    # Small NCHW example shapes consistent with a regression setting.
    inputs = jax.random.normal(k1, (2, 4, 16, 16), dtype=jnp.float32)
    targets = jax.random.normal(k2, (2, 4, 16, 16), dtype=jnp.float32)

    loss = normalized_mse_loss(inputs, targets)
    loss = jax.block_until_ready(loss)

    # Pure-JAX reference check (mirrors the PyTorch forward).
    ref = jnp.mean((inputs - targets) ** 2) / jnp.mean(targets ** 2)
    assert jnp.allclose(loss, ref, rtol=1e-5, atol=1e-6), (loss, ref)

    print("KERNEL_OK")
</pallas_src>

<mosaic_0001>
module attributes {stable_mosaic.version = 11 : i64} {
  func.func @_nmse_partial_kernel(%arg0: i32, %arg1: memref<4x512xf32, #tpu.memory_space<vmem>>, %arg2: memref<4x512xf32, #tpu.memory_space<vmem>>, %arg3: memref<1x512xf32, #tpu.memory_space<vmem>>, %arg4: memref<1x512xf32, #tpu.memory_space<vmem>>) attributes {dimension_semantics = [#tpu.dimension_semantics<parallel>], iteration_bounds = array<i64: 1>, scalar_prefetch = 0 : i64, scratch_operands = 0 : i64, tpu.core_type = #tpu.core_type<tc>, window_params = [{transform_indices = @transform_0, window_bounds = array<i64: 4, 512>}, {transform_indices = @transform_1, window_bounds = array<i64: 4, 512>}, {transform_indices = @transform_2, window_bounds = array<i64: 1, 512>}, {transform_indices = @transform_3, window_bounds = array<i64: 1, 512>}]} {
    %c0 = arith.constant 0 : index
    %c0_0 = arith.constant 0 : index
    %0 = vector.load %arg1[%c0, %c0_0] : memref<4x512xf32, #tpu.memory_space<vmem>>, vector<4x512xf32>
    %c0_1 = arith.constant 0 : index
    %c0_2 = arith.constant 0 : index
    %1 = vector.load %arg2[%c0_1, %c0_2] : memref<4x512xf32, #tpu.memory_space<vmem>>, vector<4x512xf32>
    %2 = arith.subf %0, %1 : vector<4x512xf32>
    %3 = arith.mulf %2, %2 : vector<4x512xf32>
    %cst = arith.constant dense<0.000000e+00> : vector<512xf32>
    %4 = vector.multi_reduction <add>, %3, %cst [0] : vector<4x512xf32> to vector<512xf32>
    %5 = vector.shape_cast %4 : vector<512xf32> to vector<1x512xf32>
    %c0_3 = arith.constant 0 : index
    %c0_4 = arith.constant 0 : index
    %6 = vector.load %arg3[%c0_3, %c0_4] : memref<1x512xf32, #tpu.memory_space<vmem>>, vector<1x512xf32>
    tpu.vector_store %arg3[%c0_3, %c0_4], %5 {strides = array<i32>} : memref<1x512xf32, #tpu.memory_space<vmem>>, vector<1x512xf32>,
    %7 = arith.mulf %1, %1 : vector<4x512xf32>
    %cst_5 = arith.constant dense<0.000000e+00> : vector<512xf32>
    %8 = vector.multi_reduction <add>, %7, %cst_5 [0] : vector<4x512xf32> to vector<512xf32>
    %9 = vector.shape_cast %8 : vector<512xf32> to vector<1x512xf32>
    %c0_6 = arith.constant 0 : index
    %c0_7 = arith.constant 0 : index
    %10 = vector.load %arg4[%c0_6, %c0_7] : memref<1x512xf32, #tpu.memory_space<vmem>>, vector<1x512xf32>
    tpu.vector_store %arg4[%c0_6, %c0_7], %9 {strides = array<i32>} : memref<1x512xf32, #tpu.memory_space<vmem>>, vector<1x512xf32>,
    return
  }
  func.func @transform_0(%arg0: i32) -> (i32, i32) {
    %c0_i32 = arith.constant 0 : i32
    %c0_i32_0 = arith.constant 0 : i32
    return %arg0, %c0_i32 : i32, i32
  }
  func.func @transform_1(%arg0: i32) -> (i32, i32) {
    %c0_i32 = arith.constant 0 : i32
    %c0_i32_0 = arith.constant 0 : i32
    return %arg0, %c0_i32 : i32, i32
  }
  func.func @transform_2(%arg0: i32) -> (i32, i32) {
    %c0_i32 = arith.constant 0 : i32
    %c0_i32_0 = arith.constant 0 : i32
    return %arg0, %c0_i32 : i32, i32
  }
  func.func @transform_3(%arg0: i32) -> (i32, i32) {
    %c0_i32 = arith.constant 0 : i32
    %c0_i32_0 = arith.constant 0 : i32
    return %arg0, %c0_i32 : i32, i32
  }
}

</mosaic_0001>

<bundles_post_ra>
// kernel: tpu_custom_call.1
= control target key start
LH: loop header
LB: loop body
LE: loop exit
PB: predicated region body
PF: predicated region fallthrough
CT: control target
= control target key end

     0   :  { %9 = vsyncpa [#allocation3], 0  ;;  %s404_s0 = inlined_call_operand.hbm [shape: f32[4,512], index: 0, kind: input, shape index: {}]   ;;  %s405_s1 = inlined_call_operand.hbm [shape: f32[4,512], index: 1, kind: input, shape index: {}]   ;;  %s406_s2 = inlined_call_operand.hbm [shape: f32[1,512], index: 2, kind: output, shape index: {0}]   ;;  %s407_s3 = inlined_call_operand.hbm [shape: f32[1,512], index: 3, kind: output, shape index: {1}]  }
   0x1   :  { %10 = vsyncpa [#allocation6], 0 }
   0x2   :  { %11 = vsyncpa [#allocation4], 0 }
   0x3   :  { %12 = vsyncpa [#allocation9], 0  ;;  %s313_s12 = smov [#allocation2]   ;;  %s314_s14 = smov [#allocation5]  }
   0x4   :  { %s19_s13 = sshll.u32 %s313_s12, 4  ;;  %s29_s15 = sshll.u32 %s314_s14, 4  ;;  %s20_s13 = int_to_ptr.vmem [resolvable:$true] %s19_s13  ;;  %s30_s15 = int_to_ptr.vmem [resolvable:$true] %s29_s15 }
   0x5   :  { %s217_s18 = scalar_lea.hbm %s404_s0, 256 }
   0x6   :  { %p218_p0 = scmp.ne.s32.totalorder %s404_s0, %s217_s18  ;;  %p221_p1 = scmp.lt.u32.totalorder %s217_s18, %s404_s0 }
   0x8   :  { %p223_p2 = pnand %p221_p1, %p218_p0 }
   0xa   :  { %226 = shalt.err (!%p223_p2)
}
   0xb   :  { %s227_s23 = scalar_lea.vmem %s20_s13, 256  ;;  %p232_p4 = scmp.lt.s32.totalorder %s20_s13, %s20_s13 }
   0xc   :  { %p228_p3 = scmp.ne.s32.totalorder %s20_s13, %s227_s23  ;;  %p233_p5 = scmp.lt.s32.totalorder %s227_s23, %s227_s23 }
   0xe   :  { %p234_p6 = por %p233_p5, %p232_p4 }
  0x10   :  { %p235_p7 = pnand %p234_p6, %p228_p3 }
  0x12   :  { %238 = shalt.err (!%p235_p7)
}
  0x13   :  { %22 = dma.hbm_to_vmem [thread:$0]  %s404_s0, 256, %s20_s13, [#allocation3]  }
  0x14   :  { %s239_s28 = scalar_lea.hbm %s405_s1, 256 }
  0x15   :  { %p240_p8 = scmp.ne.s32.totalorder %s405_s1, %s239_s28  ;;  %p243_p9 = scmp.lt.u32.totalorder %s239_s28, %s405_s1 }
  0x17   :  { %p245_p10 = pnand %p243_p9, %p240_p8 }
  0x19   :  { %248 = shalt.err (!%p245_p10)
}
  0x1a   :  { %s249_s6 = scalar_lea.vmem %s30_s15, 256  ;;  %p254_p12 = scmp.lt.s32.totalorder %s30_s15, %s30_s15 }
  0x1b   :  { %p250_p11 = scmp.ne.s32.totalorder %s30_s15, %s249_s6  ;;  %p255_p13 = scmp.lt.s32.totalorder %s249_s6, %s249_s6 }
  0x1d   :  { %p256_p0 = por %p255_p13, %p254_p12 }
  0x1f   :  { %p257_p1 = pnand %p256_p0, %p250_p11 }
  0x21   :  { %260 = shalt.err (!%p257_p1)
}
  0x22   :  { %32 = dma.hbm_to_vmem [thread:$0]  %s405_s1, 256, %s30_s15, [#allocation6]  }
  0x23   :  { %305 = dma.done.wait [#allocation3], 256  }
  0x24   :  { %306 = vsyncadd [#allocation3], 4294967040 }
  0x25   :  { %307 = dma.done.wait [#allocation6], 256  }
  0x26   :  { %308 = vsyncadd [#allocation6], 4294967040  ;;  %v39_v0 = vld [vmem:[#allocation2] sm:$0xff]  ;;  %v40_v1 = vld [vmem:[#allocation2 + $0x8] sm:$0xff]  ;;  %vm53_vm0 = vcmask 1043456   ;;  %v91_v7 = vlaneseq  ;;  %s316_s1 = smov [#allocation7]  }
  0x27   :  { %v41_v2 = vld [vmem:[#allocation5] sm:$0xff]  ;;  %v42_v3 = vld [vmem:[#allocation5 + $0x8] sm:$0xff]  ;;  %v315_v10 = vmov 1966171168   ;;  %s188_s8 = sshll.u32 %s316_s1, 4  ;;  %s317_s9 = smov [#allocation8]   ;;  %s189_s8 = int_to_ptr.vmem [resolvable:$true] %s188_s8 }
  0x28   :  { %v43_v4 = vsub.f32 %v39_v0, %v41_v2  ;;  %v116_v5 = vmul.f32 %v41_v2, %v41_v2  ;;  %v44_v6 = vsub.f32 %v40_v1, %v42_v3  ;;  %v117_v8 = vmul.f32 %v42_v3, %v42_v3  ;;  %s198_s10 = sshll.u32 %s317_s9, 4  ;;  %s261_s11 = scalar_lea.vmem %s189_s8, 64  ;;  %s199_s10 = int_to_ptr.vmem [resolvable:$true] %s198_s10 }
  0x29   :  { %v89_v11 = vunpack.c.l.s4 %v315_v10  ;;  %v92_v52 = vshrl.u32 %v91_v7, 7  ;;  %vm372_vm1 = vcmp.lt.s32.totalorder %v91_v7, 512  ;;  %p262_p2 = scmp.ne.s32.totalorder %s189_s8, %s261_s11  ;;  %p266_p3 = scmp.lt.s32.totalorder %s189_s8, %s189_s8 }
  0x2a   :  { %v45_v9 = vmul.f32 %v43_v4, %v43_v4  ;;  %v120_v12 = vcombine.high %v116_v5, %v116_v5  ;;  %v124_v13 = vsel %vm53_vm0, %v116_v5, 0.0  ;;  %v46_v14 = vmul.f32 %v44_v6, %v44_v6  ;;  %p267_p4 = scmp.lt.s32.totalorder %s261_s11, %s261_s11 }
  0x2b   :  { %v121_v15 = vcombine.high %v117_v8, %v117_v8  ;;  %v125_v16 = vrot.slane %v124_v13, 4  ;;  %v138_v17 = vsel %vm53_vm0, %v117_v8, 0.0  ;;  %v90_v56 = vunpack.c.0.s8 %v89_v11 }
  0x2c   :  { %v49_v18 = vcombine.high %v45_v9, %v45_v9  ;;  %v54_v19 = vsel %vm53_vm0, %v45_v9, 0.0  ;;  %v131_v20 = vsel %vm53_vm0, %v120_v12, 0.0  ;;  %v139_v21 = vrot.slane %v138_v17, 4  ;;  %p268_p5 = por %p267_p4, %p266_p3 }
  0x2d   :  { %v50_v22 = vcombine.high %v46_v14, %v46_v14  ;;  %v55_v23 = vrot.slane %v54_v19, 4  ;;  %v68_v24 = vsel %vm53_vm0, %v46_v14, 0.0  ;;  %v126_v25 = vadd.f32 %v125_v16, %v124_v13 }
  0x2e   :  { %v61_v26 = vsel %vm53_vm0, %v49_v18, 0.0  ;;  %v69_v27 = vrot.slane %v68_v24, 4  ;;  %v132_v28 = vrot.slane %v131_v20, 4  ;;  %v140_v29 = vadd.f32 %v139_v21, %v138_v17  ;;  %p269_p6 = pnand %p268_p5, %p262_p2 }
  0x2f   :  { %v56_v30 = vadd.f32 %v55_v23, %v54_v19  ;;  %v62_v31 = vrot.slane %v61_v26, 4  ;;  %v75_v32 = vsel %vm53_vm0, %v50_v22, 0.0  ;;  %v127_v33 = vrot.slane %v126_v25, 2 }
  0x30   :  { %v70_v34 = vadd.f32 %v69_v27, %v68_v24  ;;  %v76_v35 = vrot.slane %v75_v32, 4  ;;  %v133_v36 = vadd.f32 %v132_v28, %v131_v20  ;;  %v141_v37 = vrot.slane %v140_v29, 2 }
  0x31   :  { %v57_v38 = vrot.slane %v56_v30, 2  ;;  %v63_v39 = vadd.f32 %v62_v31, %v61_v26  ;;  %v128_v40 = vadd.f32 %v127_v33, %v126_v25  ;;  %v145_v41 = vsel %vm53_vm0, %v121_v15, 0.0 }
  0x32   :  { %v71_v42 = vrot.slane %v70_v34, 2  ;;  %v77_v43 = vadd.f32 %v76_v35, %v75_v32  ;;  %v134_v44 = vrot.slane %v133_v36, 2  ;;  %v142_v45 = vadd.f32 %v141_v37, %v140_v29 }
  0x33   :  { %v58_v46 = vadd.f32 %v57_v38, %v56_v30  ;;  %v64_v47 = vrot.slane %v63_v39, 2  ;;  %v129_v48 = vrot.slane %v128_v40, 1  ;;  %v146_v49 = vrot.slane %v145_v41, 4 }
  0x34   :  { %v72_v50 = vadd.f32 %v71_v42, %v70_v34  ;;  %v78_v51 = vrot.slane %v77_v43, 2  ;;  %v135_v53 = vadd.f32 %v134_v44, %v133_v36  ;;  %v143_v61 = vrot.slane %v142_v45, 1 }
  0x35   :  { %v59_v54 = vrot.slane %v58_v46, 1  ;;  %v65_v55 = vadd.f32 %v64_v47, %v63_v39  ;;  %v147_v57 = vadd.f32 %v146_v49, %v145_v41  ;;  %v130_v0 = vadd.f32 %v129_v48, %v128_v40 }
  0x36   :  { %v73_v58 = vrot.slane %v72_v50, 1  ;;  %v79_v59 = vadd.f32 %v78_v51, %v77_v43  ;;  %v136_v60 = vrot.slane %v135_v53, 1  ;;  %v93_v6 = vsub.s32 %v90_v56, %v92_v52 }
  0x37   :  { %v60_v62 = vadd.f32 %v59_v54, %v58_v46  ;;  %v66_v63 = vrot.slane %v65_v55, 1  ;;  %v148_v1 = vrot.slane %v147_v57, 2  ;;  %v144_v12 = vadd.f32 %v143_v61, %v142_v45 }
  0x38   :  { %v74_v2 = vadd.f32 %v73_v58, %v72_v50  ;;  %v80_v3 = vrot.slane %v79_v59, 1  ;;  %v137_v4 = vadd.f32 %v136_v60, %v135_v53 }
  0x39   :  { %v67_v5 = vadd.f32 %v66_v63, %v65_v55  ;;  %v149_v8 = vadd.f32 %v148_v1, %v147_v57 }
  0x3a   :  { %v81_v9 = vadd.f32 %v80_v3, %v79_v59  ;;  %v156_v11 = vcombine.low %v130_v0, %v137_v4 }
  0x3b   :  { %v86_v10 = vcombine.low %v60_v62, %v67_v5  ;;  %v150_v13 = vrot.slane %v149_v8, 1 }
  0x3c   :  { %v87_v14 = vcombine.low %v74_v2, %v81_v9  ;;  %v164_v19 = vrot.slane %v156_v11, %v93_v6 }
  0x3d   :  { %v94_v15 = vrot.slane %v86_v10, %v93_v6  ;;  %v151_v16 = vadd.f32 %v150_v13, %v149_v8 }
  0x3e   :  { %v101_v17 = vrot.slane %v87_v14, %v93_v6 }
  0x3f   :  { %v157_v18 = vcombine.low %v144_v12, %v151_v16 }
  0x40   :  { %v102_v20 = vcombine.low %v94_v15, %v101_v17 }
  0x41   :  { %v171_v22 = vrot.slane %v157_v18, %v93_v6 }
  0x42   :  { %v109_v23 = vrot.slane %v102_v20, %v93_v6 }
  0x43   :  { %v172_v24 = vcombine.low %v164_v19, %v171_v22 }
  0x44   :  { %115 = vst.msk [vmem:[#allocation7] sm:$0xf] %vm372_vm1, %v109_v23 }
  0x45   :  { %v179_v25 = vrot.slane %v172_v24, %v93_v6 }
  0x46   :  { %272 = shalt.err (!%p269_p6)
}
  0x47   :  { %s273_s14 = scalar_lea.hbm %s406_s2, 64 }
  0x48   :  { %p274_p7 = scmp.ne.s32.totalorder %s406_s2, %s273_s14  ;;  %p277_p8 = scmp.lt.u32.totalorder %s273_s14, %s406_s2 }
  0x4a   :  { %p279_p9 = pnand %p277_p8, %p274_p7 }
  0x4c   :  { %282 = shalt.err (!%p279_p9)
}
  0x4d   :  { %191 = dma.vmem_to_hbm [thread:$0]  %s189_s8, 64, %s406_s2, [#allocation4]   ;;  %181 = vst.msk [vmem:[#allocation8] sm:$0xf] %vm372_vm1, %v179_v25 }
  0x4e   :  { %s283_s21 = scalar_lea.vmem %s199_s10, 64  ;;  %p288_p11 = scmp.lt.s32.totalorder %s199_s10, %s199_s10 }
  0x4f   :  { %p284_p10 = scmp.ne.s32.totalorder %s199_s10, %s283_s21  ;;  %p289_p12 = scmp.lt.s32.totalorder %s283_s21, %s283_s21 }
  0x51   :  { %p290_p13 = por %p289_p12, %p288_p11 }
  0x53   :  { %p291_p0 = pnand %p290_p13, %p284_p10 }
  0x55   :  { %294 = shalt.err (!%p291_p0)
}
  0x56   :  { %s295_s24 = scalar_lea.hbm %s407_s3, 64 }
  0x57   :  { %p296_p1 = scmp.ne.s32.totalorder %s407_s3, %s295_s24  ;;  %p299_p2 = scmp.lt.u32.totalorder %s295_s24, %s407_s3 }
  0x59   :  { %p301_p3 = pnand %p299_p2, %p296_p1 }
  0x5b   :  { %304 = shalt.err (!%p301_p3)
}
  0x5c   :  { %201 = dma.vmem_to_hbm [thread:$0]  %s199_s10, 64, %s407_s3, [#allocation9]  }
  0x5d   :  { %309 = dma.done.wait [#allocation4], 64  }
  0x5e   :  { %310 = vsyncadd [#allocation4], 4294967232 }
  0x5f   :  { %311 = dma.done.wait [#allocation9], 64  }
  0x60   :  { %312 = vsyncadd [#allocation9], 4294967232 }
  0x61   :  { %208 = vsyncpa [#allocation3], 1 }
  0x62   :  { %209 = vsyncpa [#allocation6], 1 }
  0x63   :  { %210 = vsyncpa [#allocation4], 1 }
  0x64   :  { %211 = vsyncpa [#allocation9], 1 }

</bundles_post_ra>
